<compile_context>
chip_gen: v5e
topology: v5e:2x2
jax: 0.10.0
libtpu: 0.0.40
codegen_flags: <defaults>
</compile_context>

<pallas_src>
import functools

import jax
import jax.numpy as jnp
import numpy as np
from jax.experimental import pallas as pl
from jax.experimental.pallas import tpu as pltpu


def _largest_divisor(n, candidates):
    for c in candidates:
        if c <= n and n % c == 0:
            return c
    return None


# ----------------------------------------------------------------------------
# Kernel 1: gate Linear(C -> 1) + logsigmoid, emitting [log(rho), log(1-rho)]
# ----------------------------------------------------------------------------
def _gate_kernel(x_ref, w_ref, b_ref, out_ref):
    # x_ref: (tile_n, C) VMEM   w_ref: (1, C) VMEM   b_ref: (1, 1) SMEM
    # out_ref: (tile_n, 2) VMEM
    x = x_ref[...].astype(jnp.float32)
    w = w_ref[...].astype(jnp.float32)                       # (1, C)
    # VPU multiply + lane reduce over C (MXU is useless for an N=1 matmul).
    lin = jnp.sum(x * w, axis=-1, keepdims=True) + b_ref[0, 0]   # (tile_n, 1)
    # numerically-stable logsigmoid(lin)
    s = jnp.minimum(lin, 0.0) - jnp.log1p(jnp.exp(-jnp.abs(lin)))
    # [logsigmoid(x), logsigmoid(x) - x]  (== [log(rho), log(1-rho)])
    out_ref[...] = jnp.concatenate([s, s - lin], axis=-1)


def predict_read_write(obs, w, b, tile_n=4096):
    """obs: (B, Tt, Ts, C) -> controls: (B, Tt, Ts, 2) float32."""
    B, Tt, Ts, C = obs.shape
    N = B * Tt * Ts
    x = obs.reshape(N, C)

    # Large, sublane-aligned tiles; pad N instead of falling back to tile_n=N.
    tn = tile_n if N >= tile_n else ((N + 7) // 8) * 8
    n_pad = ((N + tn - 1) // tn) * tn
    if n_pad != N:
        x = jnp.pad(x, ((0, n_pad - N), (0, 0)))

    out = pl.pallas_call(
        _gate_kernel,
        out_shape=jax.ShapeDtypeStruct((n_pad, 2), jnp.float32),
        grid_spec=pltpu.PrefetchScalarGridSpec(
            num_scalar_prefetch=0,
            grid=(n_pad // tn,),
            in_specs=[
                pl.BlockSpec((tn, C), lambda i: (i, 0)),
                pl.BlockSpec((1, C), lambda i: (0, 0)),
                pl.BlockSpec(memory_space=pltpu.MemorySpace.SMEM),   # bias scalar
            ],
            out_specs=pl.BlockSpec((tn, 2), lambda i: (i, 0)),
        ),
        compiler_params=pltpu.CompilerParams(dimension_semantics=("parallel",)),
    )(x, w.reshape(1, C), b.reshape(1, 1))
    return out[:N].reshape(B, Tt, Ts, 2)


# ----------------------------------------------------------------------------
# Kernel 2: penalized argmax over Ts, progressive (running) max over Tt with a
#           cross-block VMEM carry, one-hot / step gamma and write mask.
# ----------------------------------------------------------------------------
def _gamma_kernel(scores_ref, *refs, penalty, write_right):
    if write_right:
        gamma_ref, bc_ref, run_ref = refs          # gamma == cumsum(one-hot) == step
    else:
        gamma_ref, step_ref, bc_ref, run_ref = refs

    tt = pl.program_id(1)
    tb, ttb, Ts = scores_ref.shape

    @pl.when(tt == 0)
    def _():
        # reset the running-max carry at the start of every batch block
        run_ref[...] = jnp.full(run_ref.shape, -1, jnp.int32)

    sc = scores_ref[...].astype(jnp.float32)
    ji = jax.lax.broadcasted_iota(jnp.int32, (tb, ttb, Ts), 2)
    if penalty:                                   # python-static flag (cf. torch attr)
        jf = jax.lax.broadcasted_iota(jnp.float32, (tb, ttb, Ts), 2)
        sc = sc - penalty * (jf * (1.0 / Ts))

    # argmax over Ts (first maximal index)
    m = jnp.max(sc, axis=-1, keepdims=True)
    bc = jnp.min(jnp.where(sc == m, ji, Ts), axis=-1)            # (tb, ttb) int32

    # running max along Tt: small within-block cummax (ttb <= 64 normally)
    # combined with the carried running max from previous Tt blocks.
    r_out = jax.lax.broadcasted_iota(jnp.int32, (tb, ttb, ttb), 1)
    r_in = jax.lax.broadcasted_iota(jnp.int32, (tb, ttb, ttb), 2)
    prefix = jnp.max(jnp.where(r_in <= r_out, bc[:, None, :], -1), axis=-1)  # (tb, ttb)
    bc_run = jnp.maximum(prefix, run_ref[...])                   # fold in carry (tb, 1)
    run_ref[...] = jnp.max(bc_run, axis=-1, keepdims=True)       # carry out

    bcb = bc_run[:, :, None]
    bc_ref[...] = bcb
    step = (ji >= bcb).astype(jnp.float32)                       # cumsum of one-hot
    if write_right:
        gamma_ref[...] = step
    else:
        gamma_ref[...] = (ji == bcb).astype(jnp.float32)
        step_ref[...] = step


def compute_gamma(scores, penalty, write_right):
    """scores: (B, Tt, Ts) -> gamma (B,Tt,Ts), read/write (B,Tt-1,Ts), bc (B,Tt)."""
    B, Tt, Ts = scores.shape
    tb = _largest_divisor(B, (8, 4, 2, 1))
    # Tt block: multiple of 8 when possible; otherwise fall back to the full Tt
    # (keeps sublane alignment; the within-block cummax is then O(Tt^2) but only
    # for pathological Tt that is not a multiple of 8).
    ttb = _largest_divisor(Tt, (64, 32, 16, 8)) or Tt

    kernel = functools.partial(_gamma_kernel, penalty=penalty,
                               write_right=write_right)

    full_spec = pl.BlockSpec((tb, ttb, Ts), lambda b, t: (b, t, 0))
    out_shapes = [jax.ShapeDtypeStruct((B, Tt, Ts), jnp.float32)]
    out_specs = [full_spec]
    if not write_right:
        out_shapes.append(jax.ShapeDtypeStruct((B, Tt, Ts), jnp.float32))
        out_specs.append(full_spec)
    out_shapes.append(jax.ShapeDtypeStruct((B, Tt, 1), jnp.int32))
    out_specs.append(pl.BlockSpec((tb, ttb, 1), lambda b, t: (b, t, 0)))

    outs = pl.pallas_call(
        kernel,
        out_shape=tuple(out_shapes),
        grid_spec=pltpu.PrefetchScalarGridSpec(
            num_scalar_prefetch=0,
            grid=(B // tb, Tt // ttb),
            in_specs=[full_spec],
            out_specs=tuple(out_specs),
            scratch_shapes=[pltpu.VMEM((tb, 1), jnp.int32)],      # running-max carry
        ),
        compiler_params=pltpu.CompilerParams(
            dimension_semantics=("parallel", "arbitrary")),
    )(scores)

    if write_right:
        gamma, bc = outs
        step = gamma
    else:
        gamma, step, bc = outs

    # aligned full-(Tt) kernel outputs; do the [:, 1:] slice / 1-write in XLA
    write = step[:, 1:]
    read = 1.0 - write
    return gamma, read, write, bc[..., 0]


# ----------------------------------------------------------------------------
# Module wrapper (parameter init mirrors the PyTorch __init__)
# ----------------------------------------------------------------------------
class LLControls:
    def __init__(self, controller_dim, oracle_penalty, write_right, key):
        # nn.Linear(controller_dim, 1): weight ~ N(0, 1/controller_dim), bias = 0
        self.w = jax.random.normal(key, (controller_dim, 1), jnp.float32) / controller_dim
        self.b = jnp.zeros((1, 1), jnp.float32)
        self.penalty = oracle_penalty
        self.write_right = write_right

    def forward(self, observations, scores):
        B, Tt, Ts = scores.shape
        controls = predict_read_write(observations, self.w, self.b)
        gamma, read, write, bc = compute_gamma(scores, self.penalty, self.write_right)
        # Diagnostic print kept to match the torch module (forces a host sync).
        AP = bc.astype(jnp.float32).mean(axis=1) / Ts
        print('AP:', ' '.join('{:.2f}'.format(float(v)) for v in np.asarray(AP)))
        return controls[:, :-1], gamma, read, write


# ----------------------------------------------------------------------------
# Pure-JAX reference for verification
# ----------------------------------------------------------------------------
def reference_forward(obs, scores, w, b, penalty, write_right):
    B, Tt, Ts = scores.shape
    lin = obs.astype(jnp.float32) @ w + b[0, 0]
    s = jax.nn.log_sigmoid(lin)
    controls = jnp.concatenate([s, s - lin], axis=-1)
    sc = scores
    if penalty:
        sc = sc - penalty * (jnp.arange(Ts, dtype=sc.dtype) / Ts)[None, None, :]
    bc = jnp.argmax(sc, axis=-1)
    bc = jax.lax.cummax(bc, axis=1)
    gamma_oh = jax.nn.one_hot(bc, Ts, dtype=jnp.float32)
    if write_right:
        gamma = jnp.cumsum(gamma_oh, axis=-1)
        write = gamma[:, 1:]
    else:
        gamma = gamma_oh
        write = jnp.cumsum(gamma_oh[:, 1:], axis=-1)
    read = 1.0 - write
    return controls[:, :-1], gamma, read, write


if __name__ == "__main__":
    B, Tt, Ts, C = 2, 8, 16, 32
    penalty = 0.5

    key = jax.random.PRNGKey(0)
    k_obs, k_scores, k_w = jax.random.split(key, 3)
    observations = jax.random.normal(k_obs, (B, Tt, Ts, C), jnp.float32)
    scores = jax.random.normal(k_scores, (B, Tt, Ts), jnp.float32)

    for write_right in (True, False):
        module = LLControls(C, penalty, write_right, k_w)
        outs = module.forward(observations, scores)
        outs = jax.block_until_ready(outs)

        refs = reference_forward(observations, scores, module.w, module.b,
                                 penalty, write_right)
        for o, r in zip(outs, refs):
            np.testing.assert_allclose(np.asarray(o), np.asarray(r),
                                       atol=1e-5, rtol=1e-5)

    print("KERNEL_OK")
</pallas_src>

<mosaic_0001>
module attributes {stable_mosaic.version = 11 : i64} {
  func.func @_gate_kernel(%arg0: i32, %arg1: memref<256x32xf32, #tpu.memory_space<vmem>>, %arg2: memref<1x32xf32, #tpu.memory_space<vmem>>, %arg3: memref<1x1xf32, #tpu.memory_space<smem>>, %arg4: memref<256x2xf32, #tpu.memory_space<vmem>>) attributes {dimension_semantics = [#tpu.dimension_semantics<parallel>], iteration_bounds = array<i64: 1>, scalar_prefetch = 0 : i64, scratch_operands = 0 : i64, tpu.core_type = #tpu.core_type<tc>, window_params = [{transform_indices = @transform_0, window_bounds = array<i64: 256, 32>}, {pipeline_mode = #tpu.pipeline_mode<synchronous>, transform_indices = @transform_1, window_bounds = array<i64: 1, 32>}, {transform_indices = @transform_2, window_bounds = array<i64: 1, 1>}, {transform_indices = @transform_3, window_bounds = array<i64: 256, 2>}]} {
    %c0 = arith.constant 0 : index
    %c0_0 = arith.constant 0 : index
    %0 = vector.load %arg1[%c0, %c0_0] : memref<256x32xf32, #tpu.memory_space<vmem>>, vector<256x32xf32>
    %c0_1 = arith.constant 0 : index
    %c0_2 = arith.constant 0 : index
    %1 = vector.load %arg2[%c0_1, %c0_2] : memref<1x32xf32, #tpu.memory_space<vmem>>, vector<1x32xf32>
    %2 = vector.broadcast %1 : vector<1x32xf32> to vector<256x32xf32>
    %3 = arith.mulf %0, %2 : vector<256x32xf32>
    %cst = arith.constant dense<0.000000e+00> : vector<256xf32>
    %4 = vector.multi_reduction <add>, %3, %cst [1] : vector<256x32xf32> to vector<256xf32>
    %5 = vector.shape_cast %4 : vector<256xf32> to vector<256x1xf32>
    %c0_3 = arith.constant 0 : index
    %c0_4 = arith.constant 0 : index
    %6 = memref.load %arg3[%c0_3, %c0_4] : memref<1x1xf32, #tpu.memory_space<smem>>
    %7 = vector.broadcast %6 : f32 to vector<256x1xf32>
    %8 = arith.addf %5, %7 : vector<256x1xf32>
    %cst_5 = arith.constant 0.000000e+00 : f32
    %9 = vector.broadcast %cst_5 : f32 to vector<256x1xf32>
    %10 = arith.minimumf %8, %9 : vector<256x1xf32>
    %11 = math.absf %8 : vector<256x1xf32>
    %cst_6 = arith.constant 0.000000e+00 : f32
    %12 = vector.broadcast %cst_6 : f32 to vector<256x1xf32>
    %13 = arith.subf %12, %11 : vector<256x1xf32>
    %14 = math.exp %13 : vector<256x1xf32>
    %15 = math.log1p %14 : vector<256x1xf32>
    %16 = arith.subf %10, %15 : vector<256x1xf32>
    %17 = arith.subf %16, %8 : vector<256x1xf32>
    %18 = tpu.concatenate %16, %17 in 1 : vector<256x1xf32>, vector<256x1xf32> -> vector<256x2xf32>
    %c0_7 = arith.constant 0 : index
    %c0_8 = arith.constant 0 : index
    %19 = vector.load %arg4[%c0_7, %c0_8] : memref<256x2xf32, #tpu.memory_space<vmem>>, vector<256x2xf32>
    tpu.vector_store %arg4[%c0_7, %c0_8], %18 {strides = array<i32>} : memref<256x2xf32, #tpu.memory_space<vmem>>, vector<256x2xf32>,
    return
  }
  func.func @transform_0(%arg0: i32) -> (i32, i32) {
    %c0_i32 = arith.constant 0 : i32
    %c0_i32_0 = arith.constant 0 : i32
    return %arg0, %c0_i32 : i32, i32
  }
  func.func @transform_1(%arg0: i32) -> (i32, i32) {
    %c0_i32 = arith.constant 0 : i32
    %c0_i32_0 = arith.constant 0 : i32
    %c0_i32_1 = arith.constant 0 : i32
    return %c0_i32, %c0_i32_0 : i32, i32
  }
  func.func @transform_2(%arg0: i32) -> (i32, i32) {
    %c0_i32 = arith.constant 0 : i32
    %c0_i32_0 = arith.constant 0 : i32
    %c0_i32_1 = arith.constant 0 : i32
    return %c0_i32, %c0_i32_0 : i32, i32
  }
  func.func @transform_3(%arg0: i32) -> (i32, i32) {
    %c0_i32 = arith.constant 0 : i32
    %c0_i32_0 = arith.constant 0 : i32
    return %arg0, %c0_i32 : i32, i32
  }
}

</mosaic_0001>

<bundles_post_ra>
// kernel: tpu_custom_call.1
= control target key start
LH: loop header
LB: loop body
LE: loop exit
PB: predicated region body
PF: predicated region fallthrough
CT: control target
= control target key end

     0   :  { %vm83_vm0 = vcmask 261120   ;;  %vm726_vm1 = vcmask 7168   ;;  %vm759_vm2 = vcmask 15360   ;;  %s1616_s0 = inlined_call_operand.vmem [shape: f32[256,32], index: 0, kind: input, shape index: {}]   ;;  %s1617_s1 = inlined_call_operand.vmem [shape: f32[1,32], index: 1, kind: input, shape index: {}]   ;;  %s1618_s2 = inlined_call_operand.<no memory space> [shape: f32[1,1], index: 2, kind: input, shape index: {}]   ;;  %s1619_s3 = inlined_call_operand.vmem [shape: f32[256,2], index: 3, kind: output, shape index: {}]  }
   0x1   :  { %v19_v0 = vld [vmem:[%s1616_s0 + $0x20] sm:$0xff]  ;;  %v17_v2 = vld [vmem:[%s1616_s0 + $0x10] sm:$0xff]  ;;  %v20_v7 = vld [vmem:[%s1616_s0 + $0x28] sm:$0xff] }
   0x2   :  { %v951_v1 = vld [vmem:[%s1617_s1] ss:$0 sm:$0xff]  ;;  %v18_v8 = vld [vmem:[%s1616_s0 + $0x18] sm:$0xff]  ;;  %v16_v12 = vld [vmem:[%s1616_s0 + $0x8] sm:$0xff] }
   0x3   :  { %v15_v3 = vld [vmem:[%s1616_s0] sm:$0xff]  ;;  %v55_v4 = vmul.f32 %v951_v1, %v19_v0  ;;  %v53_v5 = vmul.f32 %v951_v1, %v17_v2  ;;  %v56_v13 = vmul.f32 %v951_v1, %v20_v7  ;;  %v54_v14 = vmul.f32 %v951_v1, %v18_v8  ;;  %v22_v20 = vld [vmem:[%s1616_s0 + $0x38] sm:$0xff]  ;;  %v21_v21 = vld [vmem:[%s1616_s0 + $0x30] sm:$0xff] }
   0x4   :  { %v51_v6 = vmul.f32 %v951_v1, %v15_v3  ;;  %v52_v15 = vmul.f32 %v951_v1, %v16_v12  ;;  %v23_v19 = vld [vmem:[%s1616_s0 + $0x40] sm:$0xff]  ;;  %v58_v23 = vmul.f32 %v951_v1, %v22_v20  ;;  %v57_v24 = vmul.f32 %v951_v1, %v21_v21  ;;  %v26_v28 = vld [vmem:[%s1616_s0 + $0x58] sm:$0xff]  ;;  %v25_v29 = vld [vmem:[%s1616_s0 + $0x50] sm:$0xff] }
   0x5   :  { %v96_v9 = vsel %vm83_vm0, %v55_v4, 0.0  ;;  %v90_v10 = vsel %vm83_vm0, %v53_v5, 0.0  ;;  %v99_v16 = vsel %vm83_vm0, %v56_v13, 0.0  ;;  %v93_v17 = vsel %vm83_vm0, %v54_v14, 0.0  ;;  %v24_v30 = vld [vmem:[%s1616_s0 + $0x48] sm:$0xff]  ;;  %v29_v37 = vld [vmem:[%s1616_s0 + $0x70] sm:$0xff] }
   0x6   :  { %v84_v11 = vsel %vm83_vm0, %v51_v6, 0.0  ;;  %97 = vadd.xlane.f32.xlu2 %v96_v9  ;;  %91 = vadd.xlane.f32.xlu1 %v90_v10  ;;  %v87_v18 = vsel %vm83_vm0, %v52_v15, 0.0  ;;  %v59_v22 = vmul.f32 %v951_v1, %v23_v19  ;;  %v105_v26 = vsel %vm83_vm0, %v58_v23, 0.0  ;;  %v28_v38 = vld [vmem:[%s1616_s0 + $0x68] sm:$0xff]  ;;  %v27_v39 = vld [vmem:[%s1616_s0 + $0x60] sm:$0xff]  ;;  %v41_v42 = vld [vmem:[%s1616_s0 + $0xd0] sm:$0xff] }
   0x7   :  { %85 = vadd.xlane.f32.xlu0 %v84_v11  ;;  %v102_v27 = vsel %vm83_vm0, %v57_v24, 0.0  ;;  %v62_v31 = vmul.f32 %v951_v1, %v26_v28  ;;  %v61_v32 = vmul.f32 %v951_v1, %v25_v29  ;;  %v60_v33 = vmul.f32 %v951_v1, %v24_v30  ;;  %v40_v48 = vld [vmem:[%s1616_s0 + $0xc8] sm:$0xff]  ;;  %v39_v49 = vld [vmem:[%s1616_s0 + $0xc0] sm:$0xff]  ;;  %v30_v55 = vld [vmem:[%s1616_s0 + $0x78] sm:$0xff] }
   0x8   :  { %v108_v25 = vsel %vm83_vm0, %v59_v22, 0.0  ;;  %v65_v40 = vmul.f32 %v951_v1, %v29_v37  ;;  %v64_v41 = vmul.f32 %v951_v1, %v28_v38  ;;  %v63_v43 = vmul.f32 %v951_v1, %v27_v39  ;;  %v32_v51 = vld [vmem:[%s1616_s0 + $0x88] sm:$0xff]  ;;  %v31_v52 = vld [vmem:[%s1616_s0 + $0x80] sm:$0xff]  ;;  %v42_v4 = vld [vmem:[%s1616_s0 + $0xd8] sm:$0xff] }
   0x9   :  { %v117_v34 = vsel %vm83_vm0, %v62_v31, 0.0  ;;  %v114_v35 = vsel %vm83_vm0, %v61_v32, 0.0  ;;  %v111_v36 = vsel %vm83_vm0, %v60_v33, 0.0  ;;  %v77_v44 = vmul.f32 %v951_v1, %v41_v42  ;;  %v44_v60 = vld [vmem:[%s1616_s0 + $0xe8] sm:$0xff]  ;;  %v43_v3 = vld [vmem:[%s1616_s0 + $0xe0] sm:$0xff]  ;;  %v34_v7 = vld [vmem:[%s1616_s0 + $0x98] sm:$0xff] }
   0xa   :  { %v126_v46 = vsel %vm83_vm0, %v65_v40, 0.0  ;;  %v123_v47 = vsel %vm83_vm0, %v64_v41, 0.0  ;;  %v120_v50 = vsel %vm83_vm0, %v63_v43, 0.0  ;;  %v76_v53 = vmul.f32 %v951_v1, %v40_v48  ;;  %v35_v6 = vld [vmem:[%s1616_s0 + $0xa0] sm:$0xff]  ;;  %v33_v10 = vld [vmem:[%s1616_s0 + $0x90] sm:$0xff]  ;;  %v46_v15 = vld [vmem:[%s1616_s0 + $0xf8] sm:$0xff] }
   0xb   :  { %v1027_v45 = vsel %vm83_vm0, %v77_v44, 0.0  ;;  %v75_v54 = vmul.f32 %v951_v1, %v39_v49  ;;  %v68_v58 = vmul.f32 %v951_v1, %v32_v51  ;;  %v67_v59 = vmul.f32 %v951_v1, %v31_v52  ;;  %v45_v21 = vld [vmem:[%s1616_s0 + $0xf0] sm:$0xff]  ;;  %v38_v23 = vld [vmem:[%s1616_s0 + $0xb8] sm:$0xff] }
   0xc   :  { %v159_v56 = vsel %vm83_vm0, %v76_v53, 0.0  ;;  %v66_v61 = vmul.f32 %v951_v1, %v30_v55  ;;  %v80_v62 = vmul.f32 %v951_v1, %v44_v60  ;;  %v79_v8 = vmul.f32 %v951_v1, %v43_v3  ;;  %v37_v24 = vld [vmem:[%s1616_s0 + $0xb0] sm:$0xff] }
   0xd   :  { %v156_v57 = vsel %vm83_vm0, %v75_v54, 0.0  ;;  %v135_v0 = vsel %vm83_vm0, %v68_v58, 0.0  ;;  %v132_v2 = vsel %vm83_vm0, %v67_v59, 0.0  ;;  %v78_v9 = vmul.f32 %v951_v1, %v42_v4 }
   0xe   :  { %100 = vadd.xlane.f32.xlu2 %v99_v16  ;;  %94 = vadd.xlane.f32.xlu1 %v93_v17  ;;  %v171_v63 = vsel %vm83_vm0, %v80_v62, 0.0  ;;  %v129_v5 = vsel %vm83_vm0, %v66_v61, 0.0  ;;  %v168_v11 = vsel %vm83_vm0, %v79_v8, 0.0  ;;  %v71_v13 = vmul.f32 %v951_v1, %v35_v6 }
   0xf   :  { %88 = vadd.xlane.f32.xlu0 %v87_v18  ;;  %v165_v12 = vsel %vm83_vm0, %v78_v9, 0.0  ;;  %v70_v14 = vmul.f32 %v951_v1, %v34_v7  ;;  %v69_v16 = vmul.f32 %v951_v1, %v33_v10  ;;  %v82_v17 = vmul.f32 %v951_v1, %v46_v15 }
  0x10   :  { %v144_v19 = vsel %vm83_vm0, %v71_v13, 0.0  ;;  %v74_v28 = vmul.f32 %v951_v1, %v38_v23  ;;  %v73_v29 = vmul.f32 %v951_v1, %v37_v24 }
  0x11   :  { %v177_v18 = vsel %vm83_vm0, %v82_v17, 0.0  ;;  %v141_v20 = vsel %vm83_vm0, %v70_v14, 0.0  ;;  %v138_v22 = vsel %vm83_vm0, %v69_v16, 0.0 }
  0x12   :  { %v153_v31 = vsel %vm83_vm0, %v74_v28, 0.0  ;;  %v150_v32 = vsel %vm83_vm0, %v73_v29, 0.0 }
  0x16   :  { %109 = vadd.xlane.f32.xlu2 %v108_v25  ;;  %106 = vadd.xlane.f32.xlu1 %v105_v26  ;;  %v81_v25 = vmul.f32 %v951_v1, %v45_v21  ;;  %v36_v26 = vld [vmem:[%s1616_s0 + $0xa8] sm:$0xff] }
  0x17   :  { %103 = vadd.xlane.f32.xlu0 %v102_v27  ;;  %v72_v30 = vmul.f32 %v951_v1, %v36_v26  ;;  %v1116_v1 = vstv %s1618_s2 }
  0x18   :  { %v174_v27 = vsel %vm83_vm0, %v81_v25, 0.0 }
  0x19   :  { %v147_v33 = vsel %vm83_vm0, %v72_v30, 0.0 }
  0x1e   :  { %118 = vadd.xlane.f32.xlu2 %v117_v34  ;;  %115 = vadd.xlane.f32.xlu1 %v114_v35 }
  0x1f   :  { %112 = vadd.xlane.f32.xlu0 %v111_v36 }
  0x26   :  { %127 = vadd.xlane.f32.xlu2 %v126_v46  ;;  %124 = vadd.xlane.f32.xlu1 %v123_v47 }
  0x27   :  { %121 = vadd.xlane.f32.xlu0 %v120_v50 }
  0x2e   :  { %136 = vadd.xlane.f32.xlu2 %v135_v0  ;;  %133 = vadd.xlane.f32.xlu1 %v132_v2 }
  0x2f   :  { %130 = vadd.xlane.f32.xlu0 %v129_v5 }
  0x36   :  { %145 = vadd.xlane.f32.xlu2 %v144_v19  ;;  %142 = vadd.xlane.f32.xlu1 %v141_v20 }
  0x37   :  { %139 = vadd.xlane.f32.xlu0 %v138_v22 }
  0x3e   :  { %154 = vadd.xlane.f32.xlu2 %v153_v31  ;;  %151 = vadd.xlane.f32.xlu1 %v150_v32 }
  0x3f   :  { %148 = vadd.xlane.f32.xlu0 %v147_v33 }
  0x46   :  { %163 = vadd.xlane.f32.xlu2 %v1027_v45  ;;  %160 = vadd.xlane.f32.xlu1 %v159_v56 }
  0x47   :  { %157 = vadd.xlane.f32.xlu0 %v156_v57 }
  0x4e   :  { %172 = vadd.xlane.f32.xlu2 %v171_v63  ;;  %169 = vadd.xlane.f32.xlu1 %v168_v11 }
  0x4f   :  { %166 = vadd.xlane.f32.xlu0 %v165_v12 }
  0x56   :  { %178 = vadd.xlane.f32.xlu1 %v177_v18 }
  0x57   :  { %175 = vadd.xlane.f32.xlu0 %v174_v27 }
  0x79   :  { %v98_v34 = vpop.xlane.xlu2 %97  ;;  %v92_v35 = vpop.xlane.xlu1 %91 }
  0x7a   :  { %v1119_v36 = vadd.f32 %v1116_v1, %v98_v34  ;;  %v1122_v37 = vadd.f32 %v1116_v1, %v92_v35  ;;  %v86_v38 = vpop.xlane.xlu0 %85 }
  0x7b   :  { %v1125_v39 = vadd.f32 %v1116_v1, %v86_v38 }
  0x7c   :  { %v250_v40 = vand.u32 2147483647, %v1119_v36  ;;  %v248_v41 = vand.u32 2147483647, %v1122_v37  ;;  %v218_v63 = vmin.f32 %v1119_v36, 0.0  ;;  %v216_v8 = vmin.f32 %v1122_v37, 0.0 }
  0x7d   :  { %v246_v42 = vand.u32 2147483647, %v1125_v39  ;;  %v214_v9 = vmin.f32 %v1125_v39, 0.0 }
  0x7e   :  { %v282_v43 = vsub.f32 0.0, %v250_v40  ;;  %v280_v44 = vsub.f32 0.0, %v248_v41 }
  0x7f   :  { %v278_v45 = vsub.f32 0.0, %v246_v42 }
  0x80   :  { %v318_v46 = vmul.f32 1.442695, %v282_v43  ;;  %v314_v47 = vmul.f32 1.442695, %v280_v44 }
  0x81   :  { %v310_v48 = vmul.f32 1.442695, %v278_v45  ;;  %v101_v49 = vpop.xlane.xlu2 %100  ;;  %v95_v50 = vpop.xlane.xlu1 %94 }
  0x82   :  { %797 = vpow2.f32 %v318_v46  ;;  %v1131_v51 = vadd.f32 %v1116_v1, %v101_v49  ;;  %v1134_v52 = vadd.f32 %v1116_v1, %v95_v50  ;;  %v89_v53 = vpop.xlane.xlu0 %88 }
  0x83   :  { %799 = vpow2.f32 %v314_v47  ;;  %v1137_v54 = vadd.f32 %v1116_v1, %v89_v53 }
  0x84   :  { %801 = vpow2.f32 %v310_v48  ;;  %v251_v55 = vand.u32 2147483647, %v1131_v51  ;;  %v249_v56 = vand.u32 2147483647, %v1134_v52  ;;  %v219_v20 = vmin.f32 %v1131_v51, 0.0 }
  0x85   :  { %v247_v57 = vand.u32 2147483647, %v1137_v54  ;;  %v217_v23 = vmin.f32 %v1134_v52, 0.0  ;;  %v215_v28 = vmin.f32 %v1137_v54, 0.0 }
  0x86   :  { %v283_v58 = vsub.f32 0.0, %v251_v55  ;;  %v281_v59 = vsub.f32 0.0, %v249_v56 }
  0x87   :  { %v279_v3 = vsub.f32 0.0, %v247_v57 }
  0x88   :  { %v798_v60 = vpop.eup %797  ;;  %v320_v61 = vmul.f32 1.442695, %v283_v58  ;;  %v316_v7 = vmul.f32 1.442695, %v281_v59 }
  0x89   :  { %v800_v62 = vpop.eup %799  ;;  %v410_v0 = vadd.f32 1.0, %v798_v60  ;;  %v413_v2 = vmul.f32 -0.5, %v798_v60  ;;  %v110_v11 = vpop.xlane.xlu2 %109  ;;  %v416_v14 = vand.u32 2147483647, %v798_v60  ;;  %v312_v18 = vmul.f32 1.442695, %v279_v3 }
  0x8a   :  { %v802_v4 = vpop.eup %801  ;;  %v392_v5 = vadd.f32 1.0, %v800_v62  ;;  %v395_v6 = vmul.f32 -0.5, %v800_v62  ;;  %803 = vpow2.f32 %v320_v61  ;;  %v107_v12 = vpop.xlane.xlu1 %106  ;;  %v398_v16 = vand.u32 2147483647, %v800_v62 }
  0x8b   :  { %805 = vlog2.f32 %v410_v0  ;;  %v374_v10 = vadd.f32 1.0, %v802_v4  ;;  %v414_v13 = vadd.f32 1.0, %v413_v2  ;;  %v377_v15 = vmul.f32 -0.5, %v802_v4  ;;  %v104_v30 = vpop.xlane.xlu0 %103 }
  0x8c   :  { %807 = vlog2.f32 %v392_v5  ;;  %v380_v17 = vand.u32 2147483647, %v802_v4  ;;  %v396_v19 = vadd.f32 1.0, %v395_v6  ;;  %v1147_v21 = vadd.f32 %v1116_v1, %v110_v11 }
  0x8d   :  { %809 = vlog2.f32 %v374_v10  ;;  %v378_v22 = vadd.f32 1.0, %v377_v15  ;;  %v1151_v24 = vadd.f32 %v1116_v1, %v107_v12  ;;  %v415_v26 = vmul.f32 %v798_v60, %v414_v13 }
  0x8e   :  { %811 = vpow2.f32 %v316_v7  ;;  %vm1153_vm3 = vcmp.lt.f32.partialorder %v416_v14, 0.0004427343  ;;  %v254_v29 = vand.u32 2147483647, %v1147_v21  ;;  %vm1159_vm4 = vcmp.lt.f32.partialorder %v398_v16, 0.0004427343 }
  0x8f   :  { %813 = vpow2.f32 %v312_v18  ;;  %vm1163_vm5 = vcmp.lt.f32.partialorder %v380_v17, 0.0004427343  ;;  %v397_v41 = vmul.f32 %v800_v62, %v396_v19  ;;  %v253_v43 = vand.u32 2147483647, %v1151_v24 }
  0x90   :  { %v804_v25 = vpop.eup %803  ;;  %v286_v42 = vsub.f32 0.0, %v254_v29  ;;  %v379_v46 = vmul.f32 %v802_v4, %v378_v22  ;;  %v1169_v47 = vadd.f32 %v1116_v1, %v104_v30  ;;  %v222_v16 = vmin.f32 %v1147_v21, 0.0 }
  0x91   :  { %v806_v31 = vpop.eup %805  ;;  %v419_v34 = vadd.f32 1.0, %v804_v25  ;;  %v422_v35 = vmul.f32 -0.5, %v804_v25  ;;  %v425_v55 = vand.u32 2147483647, %v804_v25  ;;  %v119_v61 = vpop.xlane.xlu2 %118  ;;  %v285_v4 = vsub.f32 0.0, %v253_v43 }
  0x92   :  { %v808_v38 = vpop.eup %807  ;;  %v412_v40 = vmul.f32 0.6931472, %v806_v31  ;;  %v326_v60 = vmul.f32 1.442695, %v286_v42  ;;  %v116_v62 = vpop.xlane.xlu1 %115  ;;  %v1209_v27 = vadd.f32 %v1116_v1, %v119_v61 }
  0x93   :  { %v810_v44 = vpop.eup %809  ;;  %v394_v45 = vmul.f32 0.6931472, %v808_v38  ;;  %815 = vlog2.f32 %v419_v34  ;;  %v423_v53 = vadd.f32 1.0, %v422_v35  ;;  %vm1182_vm6 = vcmp.lt.f32.partialorder %v425_v55, 0.0004427343  ;;  %v113_v19 = vpop.xlane.xlu0 %112 }
  0x94   :  { %v812_v48 = vpop.eup %811  ;;  %v418_v49 = vsel %vm1153_vm3, %v415_v26, %v412_v40  ;;  %v376_v50 = vmul.f32 0.6931472, %v810_v44  ;;  %v324_v18 = vmul.f32 1.442695, %v285_v4  ;;  %v252_v26 = vand.u32 2147483647, %v1169_v47 }
  0x95   :  { %v1173_v56 = vpop.eup %813  ;;  %v666_v57 = vsub.f32 %v218_v63, %v418_v49  ;;  %v400_v58 = vsel %vm1159_vm4, %v397_v41, %v394_v45  ;;  %v401_v59 = vadd.f32 1.0, %v812_v48  ;;  %v404_v3 = vmul.f32 -0.5, %v812_v48 }
  0x96   :  { %v664_v0 = vsub.f32 %v216_v8, %v400_v58  ;;  %v382_v2 = vsel %vm1163_vm5, %v379_v46, %v376_v50  ;;  %v383_v7 = vadd.f32 1.0, %v1173_v56  ;;  %v424_v10 = vmul.f32 %v804_v25, %v423_v53 }
  0x97   :  { %v698_v5 = vsub.f32 %v666_v57, %v1119_v36  ;;  %v662_v6 = vsub.f32 %v214_v9, %v382_v2  ;;  %817 = vlog2.f32 %v401_v59  ;;  %v386_v8 = vmul.f32 -0.5, %v1173_v56 }
  0x98   :  { %v696_v63 = vsub.f32 %v664_v0, %v1122_v37  ;;  %v405_v15 = vadd.f32 1.0, %v404_v3  ;;  %819 = vlog2.f32 %v383_v7  ;;  %v407_v9 = vand.u32 2147483647, %v812_v48 }
  0x99   :  { %v816_v12 = vpop.eup %815  ;;  %v731_v13 = vsel %vm726_vm1, %v666_v57, %v698_v5  ;;  %v694_v14 = vsub.f32 %v662_v6, %v1125_v39  ;;  %v387_v17 = vadd.f32 1.0, %v386_v8  ;;  %821 = vpow2.f32 %v326_v60  ;;  %v128_v43 = vpop.xlane.xlu2 %127 }
  0x9a   :  { %764 = vst.msk [vmem:[%s1619_s3 + $0x20] sm:$0xff] %vm759_vm2, %v731_v13  ;;  %v729_v36 = vsel %vm726_vm1, %v664_v0, %v696_v63  ;;  %v421_v37 = vmul.f32 0.6931472, %v816_v12  ;;  %v389_v25 = vand.u32 2147483647, %v1173_v56  ;;  %v406_v31 = vmul.f32 %v812_v48, %v405_v15  ;;  %v125_v44 = vpop.xlane.xlu1 %124 }
  0x9b   :  { %762 = vst.msk [vmem:[%s1619_s3 + $0x10] sm:$0xff] %vm759_vm2, %v729_v36  ;;  %v727_v39 = vsel %vm726_vm1, %v662_v6, %v694_v14  ;;  %823 = vpow2.f32 %v324_v18  ;;  %v1214_v32 = vadd.f32 %v1116_v1, %v116_v62  ;;  %v284_v34 = vsub.f32 0.0, %v252_v26  ;;  %v122_v14 = vpop.xlane.xlu0 %121 }
  0x9c   :  { %760 = vst.msk [vmem:[%s1619_s3] sm:$0xff] %vm759_vm2, %v727_v39  ;;  %v427_v22 = vsel %vm1182_vm6, %v424_v10, %v421_v37  ;;  %v257_v35 = vand.u32 2147483647, %v1209_v27  ;;  %v1218_v38 = vadd.f32 %v1116_v1, %v113_v19  ;;  %vm408_vm7 = vcmp.lt.f32.partialorder %v407_v9, 0.0004427343 }
  0x9d   :  { %v818_v29 = vpop.eup %817  ;;  %v667_v30 = vsub.f32 %v219_v20, %v427_v22  ;;  %v388_v42 = vmul.f32 %v1173_v56, %v387_v17  ;;  %v256_v20 = vand.u32 2147483647, %v1214_v32  ;;  %v322_v48 = vmul.f32 1.442695, %v284_v34 }
  0x9e   :  { %v403_v33 = vmul.f32 0.6931472, %v818_v29  ;;  %v820_v40 = vpop.eup %819  ;;  %v289_v49 = vsub.f32 0.0, %v257_v35  ;;  %vm390_vm8 = vcmp.lt.f32.partialorder %v389_v25, 0.0004427343  ;;  %v221_v2 = vmin.f32 %v1151_v24, 0.0 }
  0x9f   :  { %v699_v41 = vsub.f32 %v667_v30, %v1131_v51  ;;  %v385_v46 = vmul.f32 0.6931472, %v820_v40  ;;  %v822_v50 = vpop.eup %821  ;;  %v288_v57 = vsub.f32 0.0, %v256_v20  ;;  %v255_v59 = vand.u32 2147483647, %v1218_v38 }
  0xa0   :  { %v409_v45 = vsel %vm408_vm7, %v406_v31, %v403_v33  ;;  %v446_v56 = vadd.f32 1.0, %v822_v50  ;;  %v449_v58 = vmul.f32 -0.5, %v822_v50  ;;  %825 = vpow2.f32 %v322_v48 }
  0xa1   :  { %v732_v53 = vsel %vm726_vm1, %v667_v30, %v699_v41  ;;  %v665_v55 = vsub.f32 %v217_v23, %v409_v45  ;;  %v391_v51 = vsel %vm390_vm8, %v388_v42, %v385_v46  ;;  %v824_v60 = vpop.eup %823  ;;  %v332_v23 = vmul.f32 1.442695, %v289_v49  ;;  %v137_v17 = vpop.xlane.xlu2 %136 }
  0xa2   :  { %765 = vst.msk [vmem:[%s1619_s3 + $0x28] sm:$0xff] %vm759_vm2, %v732_v53  ;;  %v663_v62 = vsub.f32 %v215_v28, %v391_v51  ;;  %827 = vlog2.f32 %v446_v56  ;;  %v452_v0 = vand.u32 2147483647, %v822_v50  ;;  %v437_v3 = vadd.f32 1.0, %v824_v60  ;;  %v134_v18 = vpop.xlane.xlu1 %133 }
  0xa3   :  { %v697_v61 = vsub.f32 %v665_v55, %v1134_v52  ;;  %v450_v6 = vadd.f32 1.0, %v449_v58  ;;  %v440_v7 = vmul.f32 -0.5, %v824_v60  ;;  %v443_v52 = vand.u32 2147483647, %v824_v60 }
  0xa4   :  { %v695_v5 = vsub.f32 %v663_v62, %v1137_v54  ;;  %829 = vlog2.f32 %v437_v3  ;;  %v330_v28 = vmul.f32 1.442695, %v288_v57  ;;  %v287_v63 = vsub.f32 0.0, %v255_v59 }
  0xa5   :  { %v730_v4 = vsel %vm726_vm1, %v665_v55, %v697_v61  ;;  %v441_v11 = vadd.f32 1.0, %v440_v7  ;;  %v220_v8 = vmin.f32 %v1169_v47, 0.0  ;;  %831 = vpow2.f32 %v332_v23 }
  0xa6   :  { %763 = vst.msk [vmem:[%s1619_s3 + $0x18] sm:$0xff] %vm759_vm2, %v730_v4  ;;  %v728_v10 = vsel %vm726_vm1, %v663_v62, %v695_v5  ;;  %v225_v54 = vmin.f32 %v1209_v27, 0.0  ;;  %833 = vpow2.f32 %v330_v28  ;;  %v328_v12 = vmul.f32 1.442695, %v287_v63  ;;  %v826_v15 = vpop.eup %825 }
  0xa7   :  { %761 = vst.msk [vmem:[%s1619_s3 + $0x8] sm:$0xff] %vm759_vm2, %v728_v10  ;;  %v1249_v13 = vadd.f32 %v1116_v1, %v128_v43  ;;  %v451_v36 = vmul.f32 %v822_v50, %v450_v6  ;;  %vm1251_vm9 = vcmp.lt.f32.partialorder %v452_v0, 0.0004427343  ;;  %v224_v9 = vmin.f32 %v1214_v32, 0.0 }
  0xa8   :  { %v223_v39 = vmin.f32 %v1218_v38, 0.0  ;;  %v828_v19 = vpop.eup %827  ;;  %vm1257_vm10 = vcmp.lt.f32.partialorder %v443_v52, 0.0004427343  ;;  %v428_v25 = vadd.f32 1.0, %v826_v15  ;;  %v431_v26 = vmul.f32 -0.5, %v826_v15 }
  0xa9   :  { %835 = vpow2.f32 %v328_v12  ;;  %v448_v29 = vmul.f32 0.6931472, %v828_v19  ;;  %v442_v30 = vmul.f32 %v824_v60, %v441_v11  ;;  %v260_v31 = vand.u32 2147483647, %v1249_v13 }
  0xaa   :  { %v1263_v33 = vadd.f32 %v1116_v1, %v125_v44  ;;  %v830_v34 = vpop.eup %829  ;;  %837 = vlog2.f32 %v428_v25  ;;  %v1266_v35 = vadd.f32 %v1116_v1, %v122_v14  ;;  %v1269_v40 = vadd.f32 %v1116_v1, %v137_v17 }
  0xab   :  { %v1272_v41 = vadd.f32 %v1116_v1, %v134_v18  ;;  %v832_v42 = vpop.eup %831  ;;  %v454_v20 = vsel %vm1251_vm9, %v451_v36, %v448_v29  ;;  %v439_v43 = vmul.f32 0.6931472, %v830_v34  ;;  %v432_v45 = vadd.f32 1.0, %v431_v26 }
  0xac   :  { %v434_v46 = vand.u32 2147483647, %v826_v15  ;;  %v834_v44 = vpop.eup %833  ;;  %v670_v48 = vsub.f32 %v222_v16, %v454_v20  ;;  %v473_v49 = vadd.f32 1.0, %v832_v42  ;;  %v476_v50 = vmul.f32 -0.5, %v832_v42 }
  0xad   :  { %v292_v53 = vsub.f32 0.0, %v260_v31  ;;  %v445_v55 = vsel %vm1257_vm10, %v442_v30, %v439_v43  ;;  %v479_v57 = vand.u32 2147483647, %v832_v42  ;;  %v464_v51 = vadd.f32 1.0, %v834_v44 }
  0xae   :  { %v467_v56 = vmul.f32 -0.5, %v834_v44  ;;  %v702_v59 = vsub.f32 %v670_v48, %v1147_v21  ;;  %v669_v60 = vsub.f32 %v221_v2, %v445_v55  ;;  %839 = vlog2.f32 %v473_v49 }
  0xaf   :  { %v836_v58 = vpop.eup %835  ;;  %v477_v61 = vadd.f32 1.0, %v476_v50  ;;  %vm1281_vm11 = vcmp.lt.f32.partialorder %v434_v46, 0.0004427343  ;;  %vm1285_vm12 = vcmp.lt.f32.partialorder %v479_v57, 0.0004427343  ;;  %841 = vlog2.f32 %v464_v51 }
  0xb0   :  { %v259_v23 = vand.u32 2147483647, %v1263_v33  ;;  %v838_v0 = vpop.eup %837  ;;  %v735_v3 = vsel %vm726_vm1, %v670_v48, %v702_v59  ;;  %v701_v4 = vsub.f32 %v669_v60, %v1151_v24  ;;  %v470_v21 = vand.u32 2147483647, %v834_v44 }
  0xb1   :  { %v455_v2 = vadd.f32 1.0, %v836_v58  ;;  %768 = vst.msk [vmem:[%s1619_s3 + $0x40] sm:$0xff] %vm759_vm2, %v735_v3  ;;  %v430_v5 = vmul.f32 0.6931472, %v838_v0  ;;  %v433_v6 = vmul.f32 %v826_v15, %v432_v45  ;;  %v468_v7 = vadd.f32 1.0, %v467_v56 }
  0xb2   :  { %v458_v52 = vmul.f32 -0.5, %v836_v58  ;;  %v734_v28 = vsel %vm726_vm1, %v669_v60, %v701_v4  ;;  %v478_v63 = vmul.f32 %v832_v42, %v477_v61  ;;  %v338_v10 = vmul.f32 1.442695, %v292_v53  ;;  %v131_v53 = vpop.xlane.xlu0 %130 }
  0xb3   :  { %843 = vlog2.f32 %v455_v2  ;;  %767 = vst.msk [vmem:[%s1619_s3 + $0x38] sm:$0xff] %vm759_vm2, %v734_v28  ;;  %v436_v24 = vsel %vm1281_vm11, %v433_v6, %v430_v5  ;;  %v291_v12 = vsub.f32 0.0, %v259_v23  ;;  %v258_v14 = vand.u32 2147483647, %v1266_v35 }
  0xb4   :  { %v459_v11 = vadd.f32 1.0, %v458_v52  ;;  %v840_v15 = vpop.eup %839  ;;  %v668_v36 = vsub.f32 %v220_v8, %v436_v24  ;;  %vm1306_vm13 = vcmp.lt.f32.partialorder %v470_v21, 0.0004427343  ;;  %v461_v17 = vand.u32 2147483647, %v836_v58  ;;  %v146_v21 = vpop.xlane.xlu2 %145 }
  0xb5   :  { %845 = vpow2.f32 %v338_v10  ;;  %v842_v18 = vpop.eup %841  ;;  %v475_v19 = vmul.f32 0.6931472, %v840_v15  ;;  %v469_v22 = vmul.f32 %v834_v44, %v468_v7  ;;  %v336_v25 = vmul.f32 1.442695, %v291_v12  ;;  %v143_v12 = vpop.xlane.xlu1 %142 }
  0xb6   :  { %v290_v26 = vsub.f32 0.0, %v258_v14  ;;  %v700_v29 = vsub.f32 %v668_v36, %v1169_v47  ;;  %v466_v30 = vmul.f32 0.6931472, %v842_v18  ;;  %v460_v31 = vmul.f32 %v836_v58, %v459_v11 }
  0xb7   :  { %v263_v34 = vand.u32 2147483647, %v1269_v40  ;;  %v481_v8 = vsel %vm1285_vm12, %v478_v63, %v475_v19  ;;  %847 = vpow2.f32 %v336_v25  ;;  %v262_v20 = vand.u32 2147483647, %v1272_v41 }
  0xb8   :  { %v334_v42 = vmul.f32 1.442695, %v290_v26  ;;  %v733_v45 = vsel %vm726_vm1, %v668_v36, %v700_v29  ;;  %v673_v46 = vsub.f32 %v225_v54, %v481_v8  ;;  %v472_v47 = vsel %vm1306_vm13, %v469_v22, %v466_v30 }
  0xb9   :  { %v844_v43 = vpop.eup %843  ;;  %v295_v44 = vsub.f32 0.0, %v263_v34  ;;  %766 = vst.msk [vmem:[%s1619_s3 + $0x30] sm:$0xff] %vm759_vm2, %v733_v45  ;;  %v672_v48 = vsub.f32 %v224_v9, %v472_v47  ;;  %v294_v50 = vsub.f32 0.0, %v262_v20  ;;  %vm462_vm14 = vcmp.lt.f32.partialorder %v461_v17, 0.0004427343 }
  0xba   :  { %v457_v49 = vmul.f32 0.6931472, %v844_v43  ;;  %849 = vpow2.f32 %v334_v42  ;;  %v705_v57 = vsub.f32 %v673_v46, %v1209_v27  ;;  %v228_v54 = vmin.f32 %v1249_v13, 0.0 }
  0xbb   :  { %v846_v55 = vpop.eup %845  ;;  %v344_v51 = vmul.f32 1.442695, %v295_v44  ;;  %v704_v56 = vsub.f32 %v672_v48, %v1214_v32  ;;  %v1333_v62 = vadd.f32 %v1116_v1, %v131_v53  ;;  %v342_v23 = vmul.f32 1.442695, %v294_v50 }
  0xbc   :  { %v463_v58 = vsel %vm462_vm14, %v460_v31, %v457_v49  ;;  %v500_v59 = vadd.f32 1.0, %v846_v55  ;;  %v503_v60 = vmul.f32 -0.5, %v846_v55  ;;  %v738_v61 = vsel %vm726_vm1, %v673_v46, %v705_v57 }
  0xbd   :  { %v671_v9 = vsub.f32 %v223_v39, %v463_v58  ;;  %851 = vpow2.f32 %v344_v51  ;;  %v848_v16 = vpop.eup %847  ;;  %771 = vst.msk [vmem:[%s1619_s3 + $0x58] sm:$0xff] %vm759_vm2, %v738_v61  ;;  %v737_v27 = vsel %vm726_vm1, %v672_v48, %v704_v56  ;;  %v506_v32 = vand.u32 2147483647, %v846_v55 }
  0xbe   :  { %853 = vlog2.f32 %v500_v59  ;;  %770 = vst.msk [vmem:[%s1619_s3 + $0x50] sm:$0xff] %vm759_vm2, %v737_v27  ;;  %v504_v0 = vadd.f32 1.0, %v503_v60  ;;  %v491_v3 = vadd.f32 1.0, %v848_v16  ;;  %v494_v4 = vmul.f32 -0.5, %v848_v16  ;;  %v155_v59 = vpop.xlane.xlu2 %154 }
  0xbf   :  { %v703_v39 = vsub.f32 %v671_v9, %v1218_v38  ;;  %v227_v5 = vmin.f32 %v1263_v33, 0.0  ;;  %v497_v6 = vand.u32 2147483647, %v848_v16  ;;  %v226_v7 = vmin.f32 %v1266_v35, 0.0  ;;  %v152_v38 = vpop.xlane.xlu1 %151 }
  0xc0   :  { %v850_v2 = vpop.eup %849  ;;  %855 = vpow2.f32 %v342_v23  ;;  %v231_v63 = vmin.f32 %v1269_v40, 0.0  ;;  %vm1353_vm15 = vcmp.lt.f32.partialorder %v506_v32, 0.0004427343  ;;  %v495_v10 = vadd.f32 1.0, %v494_v4 }
  0xc1   :  { %v736_v52 = vsel %vm726_vm1, %v671_v9, %v703_v39  ;;  %857 = vlog2.f32 %v491_v3  ;;  %v482_v28 = vadd.f32 1.0, %v850_v2  ;;  %v485_v24 = vmul.f32 -0.5, %v850_v2 }
  0xc2   :  { %769 = vst.msk [vmem:[%s1619_s3 + $0x48] sm:$0xff] %vm759_vm2, %v736_v52  ;;  %v1358_v11 = vadd.f32 %v1116_v1, %v146_v21  ;;  %v505_v15 = vmul.f32 %v846_v55, %v504_v0  ;;  %v488_v36 = vand.u32 2147483647, %v850_v2  ;;  %v261_v37 = vand.u32 2147483647, %v1333_v62  ;;  %v140_v55 = vpop.xlane.xlu0 %139 }
  0xc3   :  { %v852_v14 = vpop.eup %851  ;;  %859 = vlog2.f32 %v482_v28  ;;  %vm1361_vm0 = vcmp.lt.f32.partialorder %v497_v6, 0.0004427343  ;;  %v486_v19 = vadd.f32 1.0, %v485_v24  ;;  %v1366_v31 = vadd.f32 %v1116_v1, %v143_v12 }
  0xc4   :  { %v854_v17 = vpop.eup %853  ;;  %v527_v22 = vadd.f32 1.0, %v852_v14  ;;  %v530_v25 = vmul.f32 -0.5, %v852_v14  ;;  %v533_v29 = vand.u32 2147483647, %v852_v14  ;;  %v293_v30 = vsub.f32 0.0, %v261_v37 }
  0xc5   :  { %v502_v26 = vmul.f32 0.6931472, %v854_v17  ;;  %v496_v8 = vmul.f32 %v848_v16, %v495_v10  ;;  %v266_v20 = vand.u32 2147483647, %v1358_v11  ;;  %vm1371_vm3 = vcmp.lt.f32.partialorder %v488_v36, 0.0004427343 }
  0xc6   :  { %v856_v34 = vpop.eup %855  ;;  %861 = vlog2.f32 %v527_v22  ;;  %v531_v42 = vadd.f32 1.0, %v530_v25  ;;  %v487_v50 = vmul.f32 %v850_v2, %v486_v19  ;;  %vm1375_vm4 = vcmp.lt.f32.partialorder %v533_v29, 0.0004427343 }
  0xc7   :  { %v858_v43 = vpop.eup %857  ;;  %v508_v45 = vsel %vm1353_vm15, %v505_v15, %v502_v26  ;;  %v518_v47 = vadd.f32 1.0, %v856_v34  ;;  %v521_v44 = vmul.f32 -0.5, %v856_v34  ;;  %v340_v56 = vmul.f32 1.442695, %v293_v30 }
  0xc8   :  { %v676_v48 = vsub.f32 %v228_v54, %v508_v45  ;;  %v493_v49 = vmul.f32 0.6931472, %v858_v43  ;;  %v532_v51 = vmul.f32 %v852_v14, %v531_v42  ;;  %v298_v58 = vsub.f32 0.0, %v266_v20  ;;  %v164_v42 = vpop.xlane.xlu2 %163 }
  0xc9   :  { %v860_v57 = vpop.eup %859  ;;  %863 = vlog2.f32 %v518_v47  ;;  %v524_v54 = vand.u32 2147483647, %v856_v34  ;;  %v522_v27 = vadd.f32 1.0, %v521_v44  ;;  %v265_v3 = vand.u32 2147483647, %v1366_v31 }
  0xca   :  { %v708_v60 = vsub.f32 %v676_v48, %v1249_v13  ;;  %v499_v61 = vsel %vm1361_vm0, %v496_v8, %v493_v49  ;;  %v484_v9 = vmul.f32 0.6931472, %v860_v57  ;;  %865 = vpow2.f32 %v340_v56  ;;  %v149_v29 = vpop.xlane.xlu0 %148 }
  0xcb   :  { %v675_v16 = vsub.f32 %v227_v5, %v499_v61  ;;  %v350_v32 = vmul.f32 1.442695, %v298_v58  ;;  %v1387_v4 = vadd.f32 %v1116_v1, %v140_v55  ;;  %v230_v5 = vmin.f32 %v1272_v41, 0.0 }
  0xcc   :  { %v862_v23 = vpop.eup %861  ;;  %v741_v39 = vsel %vm726_vm1, %v676_v48, %v708_v60  ;;  %v490_v0 = vsel %vm1371_vm3, %v487_v50, %v484_v9  ;;  %v297_v6 = vsub.f32 0.0, %v265_v3  ;;  %v1397_v28 = vadd.f32 %v1116_v1, %v155_v59 }
  0xcd   :  { %774 = vst.msk [vmem:[%s1619_s3 + $0x70] sm:$0xff] %vm759_vm2, %v741_v39  ;;  %v707_v13 = vsub.f32 %v675_v16, %v1263_v33  ;;  %v674_v21 = vsub.f32 %v226_v7, %v490_v0  ;;  %v529_v2 = vmul.f32 0.6931472, %v862_v23  ;;  %867 = vpow2.f32 %v350_v32 }
  0xce   :  { %v264_v52 = vand.u32 2147483647, %v1387_v4  ;;  %v523_v7 = vmul.f32 %v856_v34, %v522_v27  ;;  %v348_v36 = vmul.f32 1.442695, %v297_v6  ;;  %vm525_vm5 = vcmp.lt.f32.partialorder %v524_v54, 0.0004427343 }
  0xcf   :  { %v864_v10 = vpop.eup %863  ;;  %v740_v24 = vsel %vm726_vm1, %v675_v16, %v707_v13  ;;  %v706_v12 = vsub.f32 %v674_v21, %v1266_v35  ;;  %v535_v33 = vsel %vm1375_vm4, %v532_v51, %v529_v2  ;;  %v269_v35 = vand.u32 2147483647, %v1397_v28 }
  0xd0   :  { %773 = vst.msk [vmem:[%s1619_s3 + $0x68] sm:$0xff] %vm759_vm2, %v740_v24  ;;  %v679_v14 = vsub.f32 %v231_v63, %v535_v33  ;;  %v520_v15 = vmul.f32 0.6931472, %v864_v10  ;;  %v296_v37 = vsub.f32 0.0, %v264_v52  ;;  %v866_v17 = vpop.eup %865  ;;  %v1412_v19 = vadd.f32 %v1116_v1, %v152_v38 }
  0xd1   :  { %v739_v18 = vsel %vm726_vm1, %v674_v21, %v706_v12  ;;  %v509_v25 = vadd.f32 1.0, %v866_v17  ;;  %v512_v26 = vmul.f32 -0.5, %v866_v17  ;;  %869 = vpow2.f32 %v348_v36  ;;  %v161_v21 = vpop.xlane.xlu1 %160 }
  0xd2   :  { %772 = vst.msk [vmem:[%s1619_s3 + $0x60] sm:$0xff] %vm759_vm2, %v739_v18  ;;  %v711_v22 = vsub.f32 %v679_v14, %v1269_v40  ;;  %v526_v63 = vsel %vm525_vm5, %v523_v7, %v520_v15  ;;  %v346_v8 = vmul.f32 1.442695, %v296_v37  ;;  %v229_v43 = vmin.f32 %v1333_v62, 0.0  ;;  %v158_v38 = vpop.xlane.xlu0 %157  ;;  %v173_v7 = vpop.xlane.xlu2 %172 }
  0xd3   :  { %v868_v30 = vpop.eup %867  ;;  %v678_v34 = vsub.f32 %v230_v5, %v526_v63  ;;  %871 = vlog2.f32 %v509_v25  ;;  %v515_v46 = vand.u32 2147483647, %v866_v17  ;;  %v234_v47 = vmin.f32 %v1358_v11, 0.0 }
  0xd4   :  { %v744_v20 = vsel %vm726_vm1, %v679_v14, %v711_v22  ;;  %v554_v45 = vadd.f32 1.0, %v868_v30  ;;  %v557_v44 = vmul.f32 -0.5, %v868_v30  ;;  %v513_v48 = vadd.f32 1.0, %v512_v26 }
  0xd5   :  { %777 = vst.msk [vmem:[%s1619_s3 + $0x88] sm:$0xff] %vm759_vm2, %v744_v20  ;;  %v710_v40 = vsub.f32 %v678_v34, %v1272_v41  ;;  %v301_v49 = vsub.f32 0.0, %v269_v35  ;;  %v268_v50 = vand.u32 2147483647, %v1412_v19  ;;  %v233_v57 = vmin.f32 %v1366_v31, 0.0 }
  0xd6   :  { %873 = vlog2.f32 %v554_v45  ;;  %v558_v55 = vadd.f32 1.0, %v557_v44  ;;  %v560_v41 = vand.u32 2147483647, %v868_v30  ;;  %v1435_v58 = vadd.f32 %v1116_v1, %v149_v29 }
  0xd7   :  { %v743_v53 = vsel %vm726_vm1, %v678_v34, %v710_v40  ;;  %875 = vpow2.f32 %v346_v8  ;;  %v356_v51 = vmul.f32 1.442695, %v301_v49  ;;  %v300_v56 = vsub.f32 0.0, %v268_v50  ;;  %v870_v59 = vpop.eup %869 }
  0xd8   :  { %776 = vst.msk [vmem:[%s1619_s3 + $0x80] sm:$0xff] %vm759_vm2, %v743_v53  ;;  %v232_v60 = vmin.f32 %v1387_v4, 0.0  ;;  %v237_v61 = vmin.f32 %v1397_v28, 0.0  ;;  %v236_v9 = vmin.f32 %v1412_v19, 0.0  ;;  %v1441_v54 = vadd.f32 %v1116_v1, %v164_v42 }
  0xd9   :  { %v872_v16 = vpop.eup %871  ;;  %v514_v27 = vmul.f32 %v866_v17, %v513_v48  ;;  %vm1443_vm6 = vcmp.lt.f32.partialorder %v515_v46, 0.0004427343  ;;  %v545_v23 = vadd.f32 1.0, %v870_v59  ;;  %877 = vpow2.f32 %v356_v51 }
  0xda   :  { %v511_v39 = vmul.f32 0.6931472, %v872_v16  ;;  %v559_v0 = vmul.f32 %v868_v30, %v558_v55  ;;  %v548_v3 = vmul.f32 -0.5, %v870_v59  ;;  %v354_v13 = vmul.f32 1.442695, %v300_v56 }
  0xdb   :  { %vm1447_vm7 = vcmp.lt.f32.partialorder %v560_v41, 0.0004427343  ;;  %879 = vlog2.f32 %v545_v23  ;;  %v551_v6 = vand.u32 2147483647, %v870_v59  ;;  %v267_v52 = vand.u32 2147483647, %v1435_v58 }
  0xdc   :  { %v874_v2 = vpop.eup %873  ;;  %v517_v24 = vsel %vm1443_vm6, %v514_v27, %v511_v39  ;;  %881 = vpow2.f32 %v354_v13  ;;  %v272_v33 = vand.u32 2147483647, %v1441_v54  ;;  %v1456_v37 = vadd.f32 %v1116_v1, %v161_v21 }
  0xdd   :  { %v876_v10 = vpop.eup %875  ;;  %v556_v12 = vmul.f32 0.6931472, %v874_v2  ;;  %v677_v14 = vsub.f32 %v229_v43, %v517_v24  ;;  %v549_v18 = vadd.f32 1.0, %v548_v3  ;;  %v299_v35 = vsub.f32 0.0, %v267_v52  ;;  %v170_v52 = vpop.xlane.xlu1 %169 }
  0xde   :  { %v536_v15 = vadd.f32 1.0, %v876_v10  ;;  %v539_v36 = vmul.f32 -0.5, %v876_v10  ;;  %v1461_v22 = vadd.f32 %v1116_v1, %v158_v38  ;;  %v1465_v29 = vadd.f32 %v1116_v1, %v173_v7 }
  0xdf   :  { %v562_v17 = vsel %vm1447_vm7, %v559_v0, %v556_v12  ;;  %v878_v63 = vpop.eup %877  ;;  %v709_v25 = vsub.f32 %v677_v14, %v1333_v62  ;;  %vm1467_vm8 = vcmp.lt.f32.partialorder %v551_v6, 0.0004427343  ;;  %v304_v42 = vsub.f32 0.0, %v272_v33 }
  0xe0   :  { %v682_v26 = vsub.f32 %v234_v47, %v562_v17  ;;  %883 = vlog2.f32 %v536_v15  ;;  %v581_v34 = vadd.f32 1.0, %v878_v63  ;;  %v584_v8 = vmul.f32 -0.5, %v878_v63 }
  0xe1   :  { %v880_v20 = vpop.eup %879  ;;  %v742_v43 = vsel %vm726_vm1, %v677_v14, %v709_v25  ;;  %v540_v40 = vadd.f32 1.0, %v539_v36  ;;  %v352_v46 = vmul.f32 1.442695, %v299_v35  ;;  %v550_v44 = vmul.f32 %v870_v59, %v549_v18  ;;  %v167_v36 = vpop.xlane.xlu0 %166 }
  0xe2   :  { %v714_v45 = vsub.f32 %v682_v26, %v1358_v11  ;;  %v882_v62 = vpop.eup %881  ;;  %775 = vst.msk [vmem:[%s1619_s3 + $0x78] sm:$0xff] %vm759_vm2, %v742_v43  ;;  %v547_v47 = vmul.f32 0.6931472, %v880_v20  ;;  %v542_v48 = vand.u32 2147483647, %v876_v10  ;;  %885 = vlog2.f32 %v581_v34 }
  0xe3   :  { %v585_v50 = vadd.f32 1.0, %v584_v8  ;;  %v572_v53 = vadd.f32 1.0, %v882_v62  ;;  %v575_v55 = vmul.f32 -0.5, %v882_v62  ;;  %v587_v41 = vand.u32 2147483647, %v878_v63 }
  0xe4   :  { %v747_v49 = vsel %vm726_vm1, %v682_v26, %v714_v45  ;;  %v553_v11 = vsel %vm1467_vm8, %v550_v44, %v547_v47  ;;  %887 = vpow2.f32 %v352_v46  ;;  %v362_v51 = vmul.f32 1.442695, %v304_v42 }
  0xe5   :  { %780 = vst.msk [vmem:[%s1619_s3 + $0xa0] sm:$0xff] %vm759_vm2, %v747_v49  ;;  %v681_v59 = vsub.f32 %v233_v57, %v553_v11  ;;  %v541_v16 = vmul.f32 %v876_v10, %v540_v40  ;;  %889 = vlog2.f32 %v572_v53  ;;  %v578_v27 = vand.u32 2147483647, %v882_v62 }
  0xe6   :  { %v884_v56 = vpop.eup %883  ;;  %v576_v23 = vadd.f32 1.0, %v575_v55  ;;  %891 = vpow2.f32 %v362_v51  ;;  %v271_v39 = vand.u32 2147483647, %v1456_v37  ;;  %vm543_vm9 = vcmp.lt.f32.partialorder %v542_v48, 0.0004427343 }
  0xe7   :  { %v538_v32 = vmul.f32 0.6931472, %v884_v56  ;;  %v713_v0 = vsub.f32 %v681_v59, %v1366_v31  ;;  %v586_v3 = vmul.f32 %v878_v63, %v585_v50  ;;  %v270_v13 = vand.u32 2147483647, %v1461_v22 }
  0xe8   :  { %v886_v21 = vpop.eup %885  ;;  %vm1489_vm10 = vcmp.lt.f32.partialorder %v587_v41, 0.0004427343  ;;  %v303_v57 = vsub.f32 0.0, %v271_v39  ;;  %v275_v6 = vand.u32 2147483647, %v1465_v29  ;;  %v577_v33 = vmul.f32 %v882_v62, %v576_v23  ;;  %v179_v41 = vpop.xlane.xlu1 %178 }
  0xe9   :  { %v544_v2 = vsel %vm543_vm9, %v541_v16, %v538_v32  ;;  %v746_v38 = vsel %vm726_vm1, %v681_v59, %v713_v0  ;;  %v583_v31 = vmul.f32 0.6931472, %v886_v21  ;;  %vm1497_vm11 = vcmp.lt.f32.partialorder %v578_v27, 0.0004427343 }
  0xea   :  { %v680_v10 = vsub.f32 %v232_v60, %v544_v2  ;;  %v888_v12 = vpop.eup %887  ;;  %779 = vst.msk [vmem:[%s1619_s3 + $0x98] sm:$0xff] %vm759_vm2, %v746_v38  ;;  %v360_v7 = vmul.f32 1.442695, %v303_v57  ;;  %v302_v14 = vsub.f32 0.0, %v270_v13  ;;  %v307_v15 = vsub.f32 0.0, %v275_v6  ;;  %v176_v38 = vpop.xlane.xlu0 %175 }
  0xeb   :  { %v890_v17 = vpop.eup %889  ;;  %v589_v60 = vsel %vm1489_vm10, %v586_v3, %v583_v31  ;;  %v563_v35 = vadd.f32 1.0, %v888_v12  ;;  %v566_v63 = vmul.f32 -0.5, %v888_v12  ;;  %v1511_v34 = vadd.f32 %v1116_v1, %v170_v52 }
  0xec   :  { %v712_v18 = vsub.f32 %v680_v10, %v1387_v4  ;;  %v892_v25 = vpop.eup %891  ;;  %v685_v26 = vsub.f32 %v237_v61, %v589_v60  ;;  %v574_v30 = vmul.f32 0.6931472, %v890_v17  ;;  %893 = vpow2.f32 %v360_v7 }
  0xed   :  { %895 = vlog2.f32 %v563_v35  ;;  %v608_v42 = vadd.f32 1.0, %v892_v25  ;;  %v1515_v4 = vadd.f32 %v1116_v1, %v167_v36  ;;  %v567_v43 = vadd.f32 1.0, %v566_v63 }
  0xee   :  { %v745_v8 = vsel %vm726_vm1, %v680_v10, %v712_v18  ;;  %v717_v20 = vsub.f32 %v685_v26, %v1397_v28  ;;  %v580_v61 = vsel %vm1497_vm11, %v577_v33, %v574_v30  ;;  %v611_v45 = vmul.f32 -0.5, %v892_v25 }
  0xef   :  { %778 = vst.msk [vmem:[%s1619_s3 + $0x90] sm:$0xff] %vm759_vm2, %v745_v8  ;;  %v684_v40 = vsub.f32 %v236_v9, %v580_v61  ;;  %v569_v46 = vand.u32 2147483647, %v888_v12  ;;  %897 = vlog2.f32 %v608_v42  ;;  %v358_v44 = vmul.f32 1.442695, %v302_v14 }
  0xf0   :  { %v750_v62 = vsel %vm726_vm1, %v685_v26, %v717_v20  ;;  %v612_v47 = vadd.f32 1.0, %v611_v45  ;;  %v368_v48 = vmul.f32 1.442695, %v307_v15  ;;  %v614_v49 = vand.u32 2147483647, %v892_v25 }
  0xf1   :  { %783 = vst.msk [vmem:[%s1619_s3 + $0xb8] sm:$0xff] %vm759_vm2, %v750_v62  ;;  %v716_v28 = vsub.f32 %v684_v40, %v1412_v19  ;;  %v274_v50 = vand.u32 2147483647, %v1511_v34  ;;  %v235_v9 = vmin.f32 %v1435_v58, 0.0  ;;  %v568_v55 = vmul.f32 %v888_v12, %v567_v43 }
  0xf2   :  { %v894_v53 = vpop.eup %893  ;;  %899 = vpow2.f32 %v358_v44  ;;  %v273_v11 = vand.u32 2147483647, %v1515_v4  ;;  %v613_v59 = vmul.f32 %v892_v25, %v612_v47  ;;  %vm570_vm12 = vcmp.lt.f32.partialorder %v569_v46, 0.0004427343 }
  0xf3   :  { %v896_v51 = vpop.eup %895  ;;  %v749_v56 = vsel %vm726_vm1, %v684_v40, %v716_v28  ;;  %v599_v16 = vadd.f32 1.0, %v894_v53  ;;  %v602_v27 = vmul.f32 -0.5, %v894_v53  ;;  %901 = vpow2.f32 %v368_v48 }
  0xf4   :  { %782 = vst.msk [vmem:[%s1619_s3 + $0xb0] sm:$0xff] %vm759_vm2, %v749_v56  ;;  %v565_v19 = vmul.f32 0.6931472, %v896_v51  ;;  %v306_v32 = vsub.f32 0.0, %v274_v50  ;;  %v305_v23 = vsub.f32 0.0, %v273_v11  ;;  %v1545_v3 = vadd.f32 %v1116_v1, %v179_v41 }
  0xf5   :  { %v898_v39 = vpop.eup %897  ;;  %vm1540_vm13 = vcmp.lt.f32.partialorder %v614_v49, 0.0004427343  ;;  %903 = vlog2.f32 %v599_v16  ;;  %v240_v6 = vmin.f32 %v1441_v54, 0.0  ;;  %v603_v24 = vadd.f32 1.0, %v602_v27 }
  0xf6   :  { %v571_v13 = vsel %vm570_vm12, %v568_v55, %v565_v19  ;;  %v610_v21 = vmul.f32 0.6931472, %v898_v39  ;;  %v366_v2 = vmul.f32 1.442695, %v306_v32  ;;  %v364_v5 = vmul.f32 1.442695, %v305_v23 }
  0xf7   :  { %v683_v57 = vsub.f32 %v235_v9, %v571_v13  ;;  %v277_v52 = vand.u32 2147483647, %v1545_v3  ;;  %v605_v12 = vand.u32 2147483647, %v894_v53  ;;  %v1553_v18 = vadd.f32 %v1116_v1, %v176_v38 }
  0xf8   :  { %v900_v10 = vpop.eup %899  ;;  %v616_v31 = vsel %vm1540_vm13, %v613_v59, %v610_v21  ;;  %905 = vpow2.f32 %v366_v2  ;;  %v239_v25 = vmin.f32 %v1456_v37, 0.0  ;;  %v604_v26 = vmul.f32 %v894_v53, %v603_v24 }
  0xf9   :  { %v715_v33 = vsub.f32 %v683_v57, %v1435_v58  ;;  %v688_v7 = vsub.f32 %v240_v6, %v616_v31  ;;  %v590_v14 = vadd.f32 1.0, %v900_v10  ;;  %v593_v15 = vmul.f32 -0.5, %v900_v10  ;;  %v902_v36 = vpop.eup %901 }
  0xfa   :  { %907 = vpow2.f32 %v364_v5  ;;  %v309_v17 = vsub.f32 0.0, %v277_v52  ;;  %vm606_vm14 = vcmp.lt.f32.partialorder %v605_v12, 0.0004427343  ;;  %v635_v30 = vadd.f32 1.0, %v902_v36 }
  0xfb   :  { %v904_v60 = vpop.eup %903  ;;  %v748_v35 = vsel %vm726_vm1, %v683_v57, %v715_v33  ;;  %v720_v63 = vsub.f32 %v688_v7, %v1441_v54  ;;  %909 = vlog2.f32 %v590_v14  ;;  %v594_v8 = vadd.f32 1.0, %v593_v15 }
  0xfc   :  { %781 = vst.msk [vmem:[%s1619_s3 + $0xa8] sm:$0xff] %vm759_vm2, %v748_v35  ;;  %v601_v58 = vmul.f32 0.6931472, %v904_v60  ;;  %v596_v42 = vand.u32 2147483647, %v900_v10  ;;  %v638_v20 = vmul.f32 -0.5, %v902_v36  ;;  %911 = vlog2.f32 %v635_v30 }
  0xfd   :  { %v753_v1 = vsel %vm726_vm1, %v688_v7, %v720_v63  ;;  %v372_v43 = vmul.f32 1.442695, %v309_v17  ;;  %v276_v45 = vand.u32 2147483647, %v1553_v18  ;;  %v641_v44 = vand.u32 2147483647, %v902_v36 }
  0xfe   :  { %v906_v61 = vpop.eup %905  ;;  %786 = vst.msk [vmem:[%s1619_s3 + $0xd0] sm:$0xff] %vm759_vm2, %v753_v1  ;;  %v607_v54 = vsel %vm606_vm14, %v604_v26, %v601_v58  ;;  %v639_v46 = vadd.f32 1.0, %v638_v20  ;;  %v238_v53 = vmin.f32 %v1461_v22, 0.0  ;;  %v595_v11 = vmul.f32 %v900_v10, %v594_v8 }
  0xff   :  { %v687_v40 = vsub.f32 %v239_v25, %v607_v54  ;;  %v626_v62 = vadd.f32 1.0, %v906_v61  ;;  %v629_v48 = vmul.f32 -0.5, %v906_v61  ;;  %913 = vpow2.f32 %v372_v43 }
 0x100   :  { %v908_v47 = vpop.eup %907  ;;  %v308_v28 = vsub.f32 0.0, %v276_v45  ;;  %vm597_vm15 = vcmp.lt.f32.partialorder %v596_v42, 0.0004427343  ;;  %v640_v56 = vmul.f32 %v902_v36, %v639_v46  ;;  %vm642_vm0 = vcmp.lt.f32.partialorder %v641_v44, 0.0004427343 }
 0x101   :  { %v910_v49 = vpop.eup %909  ;;  %v719_v50 = vsub.f32 %v687_v40, %v1456_v37  ;;  %915 = vlog2.f32 %v626_v62  ;;  %v617_v9 = vadd.f32 1.0, %v908_v47  ;;  %v620_v41 = vmul.f32 -0.5, %v908_v47 }
 0x102   :  { %v592_v55 = vmul.f32 0.6931472, %v910_v49  ;;  %v370_v59 = vmul.f32 1.442695, %v308_v28  ;;  %v912_v16 = vpop.eup %911  ;;  %v630_v27 = vadd.f32 1.0, %v629_v48  ;;  %v243_v0 = vmin.f32 %v1465_v29, 0.0 }
 0x103   :  { %v752_v51 = vsel %vm726_vm1, %v687_v40, %v719_v50  ;;  %917 = vlog2.f32 %v617_v9  ;;  %v637_v32 = vmul.f32 0.6931472, %v912_v16  ;;  %v632_v23 = vand.u32 2147483647, %v906_v61 }
 0x104   :  { %785 = vst.msk [vmem:[%s1619_s3 + $0xc8] sm:$0xff] %vm759_vm2, %v752_v51  ;;  %v598_v37 = vsel %vm597_vm15, %v595_v11, %v592_v55  ;;  %919 = vpow2.f32 %v370_v59  ;;  %v621_v13 = vadd.f32 1.0, %v620_v41  ;;  %v623_v57 = vand.u32 2147483647, %v908_v47 }
 0x105   :  { %v686_v19 = vsub.f32 %v238_v53, %v598_v37  ;;  %v914_v39 = vpop.eup %913  ;;  %v643_v5 = vsel %vm642_vm0, %v640_v56, %v637_v32  ;;  %v631_v10 = vmul.f32 %v906_v61, %v630_v27  ;;  %v242_v33 = vmin.f32 %v1511_v34, 0.0 }
 0x106   :  { %v653_v6 = vadd.f32 1.0, %v914_v39  ;;  %v691_v52 = vsub.f32 %v243_v0, %v643_v5  ;;  %v656_v31 = vmul.f32 -0.5, %v914_v39  ;;  %vm633_vm3 = vcmp.lt.f32.partialorder %v632_v23, 0.0004427343 }
 0x107   :  { %v916_v21 = vpop.eup %915  ;;  %v718_v2 = vsub.f32 %v686_v19, %v1461_v22  ;;  %v622_v15 = vmul.f32 %v908_v47, %v621_v13  ;;  %v241_v60 = vmin.f32 %v1515_v4, 0.0  ;;  %vm624_vm4 = vcmp.lt.f32.partialorder %v623_v57, 0.0004427343 }
 0x108   :  { %v628_v38 = vmul.f32 0.6931472, %v916_v21  ;;  %921 = vlog2.f32 %v653_v6  ;;  %v723_v22 = vsub.f32 %v691_v52, %v1465_v29  ;;  %v657_v25 = vadd.f32 1.0, %v656_v31 }
 0x109   :  { %v918_v24 = vpop.eup %917  ;;  %v751_v12 = vsel %vm726_vm1, %v686_v19, %v718_v2  ;;  %v659_v30 = vand.u32 2147483647, %v914_v39  ;;  %v244_v28 = vmin.f32 %v1553_v18, 0.0 }
 0x10a   :  { %784 = vst.msk [vmem:[%s1619_s3 + $0xc0] sm:$0xff] %vm759_vm2, %v751_v12  ;;  %v634_v7 = vsel %vm633_vm3, %v631_v10, %v628_v38  ;;  %v619_v14 = vmul.f32 0.6931472, %v918_v24  ;;  %v920_v36 = vpop.eup %919  ;;  %v756_v35 = vsel %vm726_vm1, %v691_v52, %v723_v22  ;;  %v658_v54 = vmul.f32 %v914_v39, %v657_v25 }
 0x10b   :  { %v690_v17 = vsub.f32 %v242_v33, %v634_v7  ;;  %v644_v58 = vadd.f32 1.0, %v920_v36  ;;  %789 = vst.msk [vmem:[%s1619_s3 + $0xe8] sm:$0xff] %vm759_vm2, %v756_v35  ;;  %v647_v1 = vmul.f32 -0.5, %v920_v36  ;;  %vm660_vm5 = vcmp.lt.f32.partialorder %v659_v30, 0.0004427343 }
 0x10c   :  { %v625_v63 = vsel %vm624_vm4, %v622_v15, %v619_v14 }
 0x10d   :  { %v722_v29 = vsub.f32 %v690_v17, %v1511_v34  ;;  %v689_v26 = vsub.f32 %v241_v60, %v625_v63  ;;  %923 = vlog2.f32 %v644_v58  ;;  %v245_v34 = vmin.f32 %v1545_v3, 0.0 }
 0x10e   :  { %v922_v8 = vpop.eup %921  ;;  %v648_v45 = vadd.f32 1.0, %v647_v1 }
 0x10f   :  { %v755_v42 = vsel %vm726_vm1, %v690_v17, %v722_v29  ;;  %v721_v20 = vsub.f32 %v689_v26, %v1515_v4  ;;  %v655_v61 = vmul.f32 0.6931472, %v922_v8  ;;  %v650_v4 = vand.u32 2147483647, %v920_v36 }
 0x110   :  { %788 = vst.msk [vmem:[%s1619_s3 + $0xe0] sm:$0xff] %vm759_vm2, %v755_v42  ;;  %v649_v48 = vmul.f32 %v920_v36, %v648_v45 }
 0x111   :  { %v754_v43 = vsel %vm726_vm1, %v689_v26, %v721_v20  ;;  %v661_v40 = vsel %vm660_vm5, %v658_v54, %v655_v61  ;;  %vm651_vm6 = vcmp.lt.f32.partialorder %v650_v4, 0.0004427343 }
 0x112   :  { %787 = vst.msk [vmem:[%s1619_s3 + $0xd8] sm:$0xff] %vm759_vm2, %v754_v43  ;;  %v693_v46 = vsub.f32 %v245_v34, %v661_v40 }
 0x113   :  { %v924_v62 = vpop.eup %923 }
 0x114   :  { %v725_v47 = vsub.f32 %v693_v46, %v1545_v3  ;;  %v646_v44 = vmul.f32 0.6931472, %v924_v62 }
 0x116   :  { %v758_v49 = vsel %vm726_vm1, %v693_v46, %v725_v47  ;;  %v652_v50 = vsel %vm651_vm6, %v649_v48, %v646_v44 }
 0x117   :  { %791 = vst.msk [vmem:[%s1619_s3 + $0xf8] sm:$0xff] %vm759_vm2, %v758_v49  ;;  %v692_v53 = vsub.f32 %v244_v28, %v652_v50 }
 0x119   :  { %v724_v9 = vsub.f32 %v692_v53, %v1553_v18 }
 0x11b   :  { %v757_v55 = vsel %vm726_vm1, %v692_v53, %v724_v9 }
 0x11c   :  { %790 = vst.msk [vmem:[%s1619_s3 + $0xf0] sm:$0xff] %vm759_vm2, %v757_v55 }

</bundles_post_ra>
